<compile_context>
chip_gen: v6e
topology: v6e:2x2x1
jax: 0.10.0
libtpu: 0.0.40
codegen_flags: <defaults>
</compile_context>

<pallas_src>
import functools
import math

import jax
import jax.numpy as jnp
from jax.experimental import pallas as pl
from jax.experimental.pallas import tpu as pltpu


def _round_up(x, m):
    return ((x + m - 1) // m) * m


def _tile_f_from_fp(fp):
    # Padded F is always a multiple of the tile chosen in prepare_weights,
    # so this re-derivation is exact (see prepare_weights).
    return min(4096, fp)


def _tile_d(dp):
    # 256 when it divides Dp (so real CLIP D=768 gets 3 "parallel" D tiles
    # that shard the weight stream across v7x's 2 TCs), else 128.
    return math.gcd(dp, 256)


# ---------------------------------------------------------------------------
# Pass 1: emb[Bp, Dp] = x[Bp, Fp] @ w[Fp, Dp]
#   grid = (n_tiles_d "parallel", n_tiles_f "arbitrary")
#   The f32 output block is the accumulator (resident across the F axis).
# ---------------------------------------------------------------------------
def _embed_kernel(x_ref, w_ref, emb_ref):
    k = pl.program_id(1)

    @pl.when(k == 0)
    def _():
        emb_ref[...] = jnp.zeros_like(emb_ref)

    # bf16 operands, f32 accumulation on the MXU.
    emb_ref[...] += jnp.dot(x_ref[...], w_ref[...],
                            preferred_element_type=jnp.float32)


# ---------------------------------------------------------------------------
# Pass 2: scores[Bp, Np] = l2norm(emb)[Bp, Dp] @ sem_t[Dp, Np]
#   Tiny kernel; emb stays VMEM-resident, N is tiled lane-dense.
# ---------------------------------------------------------------------------
def _score_kernel(emb_ref, sem_ref, out_ref):
    emb = emb_ref[...]
    # CLIP-style L2 normalization (f32; padded D columns are zero and padded
    # batch rows give emb=0 -> scores 0, sliced off by the wrapper).
    inv_norm = jax.lax.rsqrt(
        jnp.sum(emb * emb, axis=-1, keepdims=True) + 1e-12)
    emb_n = (emb * inv_norm).astype(jnp.bfloat16)
    # Canonical [M,K]x[K,N] contraction; semantic_modal was pre-transposed.
    out_ref[...] = jnp.dot(emb_n, sem_ref[...],
                           preferred_element_type=jnp.float32)


def prepare_weights(w_embed, semantic_modal):
    """One-time (per-model) weight preparation, hoisted out of the per-call
    path: bf16 cast, lane-dense padding, and semantic_modal transposed to
    [Dp, Np].  At real CLIP shapes (F~150K, D=768) doing this per call costs
    more HBM traffic than the kernel itself."""
    F, D = w_embed.shape
    N, D2 = semantic_modal.shape
    assert D2 == D
    Dp = _round_up(D, 128)
    Np = _round_up(N, 128)
    tile_f = min(4096, _round_up(F, 512))
    Fp = _round_up(F, tile_f)
    w_pad = jnp.pad(w_embed.astype(jnp.bfloat16),
                    ((0, Fp - F), (0, Dp - D)))
    sem_t_pad = jnp.pad(jnp.transpose(semantic_modal).astype(jnp.bfloat16),
                        ((0, Dp - D), (0, Np - N)))
    return w_pad, sem_t_pad


@functools.partial(jax.jit, static_argnames=("out_n", "num_frames"))
def languagebind_super_forward(vision_inputs, w_pad, sem_t_pad, *, out_n,
                               num_frames=8):
    """vision_inputs: [B, C, H, W] (NCHW).
    w_pad: [Fp, Dp] bf16 (from prepare_weights).
    sem_t_pad: [Dp, Np] bf16 (from prepare_weights).
    Returns scores [B, out_n]."""
    del num_frames  # temporal repeat is a no-op for the mocked encoder
    B, C, H, W = vision_inputs.shape
    F = C * H * W
    Fp, Dp = w_pad.shape
    Dp2, Np = sem_t_pad.shape
    assert Dp2 == Dp and Fp >= F

    Bp = _round_up(B, 16)          # sublane padding (bf16 packs 16 rows/vreg)
    TILE_F = _tile_f_from_fp(Fp)
    TILE_D = _tile_d(Dp)
    TILE_N = 128

    # Per-call activation prep only (weights already prepared offline).
    x = jnp.pad(vision_inputs.reshape(B, F).astype(jnp.bfloat16),
                ((0, Bp - B), (0, Fp - F)))

    n_tiles_d = Dp // TILE_D
    n_tiles_f = Fp // TILE_F

    # Pass 1: single F reduction producing the (unnormalized) embedding.
    emb = pl.pallas_call(
        _embed_kernel,
        out_shape=jax.ShapeDtypeStruct((Bp, Dp), jnp.float32),
        grid_spec=pltpu.PrefetchScalarGridSpec(
            num_scalar_prefetch=0,
            grid=(n_tiles_d, n_tiles_f),
            in_specs=[
                pl.BlockSpec((Bp, TILE_F), lambda i, k: (0, k)),
                pl.BlockSpec((TILE_F, TILE_D), lambda i, k: (k, i)),
            ],
            out_specs=pl.BlockSpec((Bp, TILE_D), lambda i, k: (0, i)),
        ),
        compiler_params=pltpu.CompilerParams(
            dimension_semantics=("parallel", "arbitrary")),
    )(x, w_pad)

    # Pass 2: normalize + score (tiny; sem tile streamed, emb resident).
    n_tiles_n = Np // TILE_N
    scores_p = pl.pallas_call(
        _score_kernel,
        out_shape=jax.ShapeDtypeStruct((Bp, Np), jnp.float32),
        grid_spec=pltpu.PrefetchScalarGridSpec(
            num_scalar_prefetch=0,
            grid=(n_tiles_n,),
            in_specs=[
                pl.BlockSpec((Bp, Dp), lambda j: (0, 0)),
                pl.BlockSpec((Dp, TILE_N), lambda j: (0, j)),
            ],
            out_specs=pl.BlockSpec((Bp, TILE_N), lambda j: (0, j)),
        ),
        compiler_params=pltpu.CompilerParams(
            dimension_semantics=("parallel",)),
    )(emb, sem_t_pad)

    return scores_p[:B, :out_n]


def _reference_forward(vision_inputs, w_embed, semantic_modal, num_frames=8):
    """Plain-JAX reference mirroring the torch forward literally
    (unsqueeze + repeat to T frames, per-frame encode, mean pool, normalize,
    score), with the same bf16-operand / f32-accumulate numerics."""
    B, C, H, W = vision_inputs.shape
    F = C * H * W
    video = jnp.broadcast_to(vision_inputs[:, :, None, :, :],
                             (B, C, num_frames, H, W))
    frames = jnp.transpose(video, (0, 2, 1, 3, 4)).reshape(
        B, num_frames, F).astype(jnp.bfloat16)
    feat = jnp.einsum("btf,fd->btd", frames, w_embed.astype(jnp.bfloat16),
                      preferred_element_type=jnp.float32)
    emb = feat.mean(axis=1)
    emb = emb * jax.lax.rsqrt(
        jnp.sum(emb * emb, axis=-1, keepdims=True) + 1e-12)
    return jax.lax.dot_general(
        emb.astype(jnp.bfloat16), semantic_modal.astype(jnp.bfloat16),
        dimension_numbers=(((1,), (1,)), ((), ())),
        preferred_element_type=jnp.float32)


if __name__ == "__main__":
    # Small shapes consistent with the module's forward.
    B, C, H, W = 2, 4, 16, 16      # vision input (NCHW)
    T = 8                          # temporal repeat factor (fixed by forward)
    D = 32                         # embedding dim
    N = 8                          # number of semantic-modal entries (classes)

    key = jax.random.PRNGKey(0)
    k_x, k_w, k_s = jax.random.split(key, 3)

    vision = jax.random.normal(k_x, (B, C, H, W), dtype=jnp.float32)
    w_embed = (jax.random.normal(k_w, (C * H * W, D), dtype=jnp.float32)
               * (1.0 / jnp.sqrt(float(C * H * W))))
    semantic = jax.random.normal(k_s, (N, D), dtype=jnp.float32)
    semantic = semantic / jnp.linalg.norm(semantic, axis=-1, keepdims=True)

    # One-time weight preparation (hoisted out of the per-call path).
    w_pad, sem_t_pad = prepare_weights(w_embed, semantic)
    w_pad, sem_t_pad = jax.block_until_ready((w_pad, sem_t_pad))

    scores = languagebind_super_forward(vision, w_pad, sem_t_pad,
                                        out_n=N, num_frames=T)
    scores = jax.block_until_ready(scores)

    ref = _reference_forward(vision, w_embed, semantic, num_frames=T)
    assert scores.shape == (B, N)
    assert jnp.allclose(scores, ref, atol=1e-2, rtol=1e-2), (
        f"max abs err {jnp.max(jnp.abs(scores - ref))}")

    print("KERNEL_OK")
</pallas_src>

<mosaic_0001>
module attributes {stable_mosaic.version = 11 : i64} {
  func.func @_embed_kernel(%arg0: i32, %arg1: i32, %arg2: memref<16x1024xbf16, #tpu.memory_space<vmem>>, %arg3: memref<1024x128xbf16, #tpu.memory_space<vmem>>, %arg4: memref<16x128xf32, #tpu.memory_space<vmem>>) attributes {dimension_semantics = [#tpu.dimension_semantics<parallel>, #tpu.dimension_semantics<arbitrary>], iteration_bounds = array<i64: 1, 1>, scalar_prefetch = 0 : i64, scratch_operands = 0 : i64, tpu.core_type = #tpu.core_type<tc>, window_params = [{transform_indices = @transform_0, window_bounds = array<i64: 16, 1024>}, {transform_indices = @transform_1, window_bounds = array<i64: 1024, 128>}, {transform_indices = @transform_2, window_bounds = array<i64: 16, 128>}]} {
    %c0_i32 = arith.constant 0 : i32
    %0 = arith.cmpi eq, %arg1, %c0_i32 : i32
    %1 = arith.extui %0 : i1 to i32
    %c0_i32_0 = arith.constant 0 : i32
    %2 = arith.cmpi ne, %1, %c0_i32_0 : i32
    scf.if %2 {
      %cst_8 = arith.constant 0.000000e+00 : f32
      %9 = vector.broadcast %cst_8 : f32 to vector<16x128xf32>
      %c0_9 = arith.constant 0 : index
      %c0_10 = arith.constant 0 : index
      %10 = vector.load %arg4[%c0_9, %c0_10] : memref<16x128xf32, #tpu.memory_space<vmem>>, vector<16x128xf32>
      tpu.vector_store %arg4[%c0_9, %c0_10], %9 {strides = array<i32>} : memref<16x128xf32, #tpu.memory_space<vmem>>, vector<16x128xf32>,
    } else {
    }
    %c0 = arith.constant 0 : index
    %c0_1 = arith.constant 0 : index
    %3 = vector.load %arg4[%c0, %c0_1] : memref<16x128xf32, #tpu.memory_space<vmem>>, vector<16x128xf32>
    %c0_2 = arith.constant 0 : index
    %c0_3 = arith.constant 0 : index
    %4 = vector.load %arg2[%c0_2, %c0_3] : memref<16x1024xbf16, #tpu.memory_space<vmem>>, vector<16x1024xbf16>
    %c0_4 = arith.constant 0 : index
    %c0_5 = arith.constant 0 : index
    %5 = vector.load %arg3[%c0_4, %c0_5] : memref<1024x128xbf16, #tpu.memory_space<vmem>>, vector<1024x128xbf16>
    %cst = arith.constant dense<0.000000e+00> : vector<16x128xf32>
    %6 = tpu.matmul %4, %5, %cst {dimension_numbers = #tpu.dot_dimension_numbers<[1], [0], [0], [1], [0, 0, 1, 1], [], []>} : vector<16x1024xbf16>, vector<1024x128xbf16>, vector<16x128xf32> -> vector<16x128xf32>
    %7 = arith.addf %3, %6 : vector<16x128xf32>
    %c0_6 = arith.constant 0 : index
    %c0_7 = arith.constant 0 : index
    %8 = vector.load %arg4[%c0_6, %c0_7] : memref<16x128xf32, #tpu.memory_space<vmem>>, vector<16x128xf32>
    tpu.vector_store %arg4[%c0_6, %c0_7], %7 {strides = array<i32>} : memref<16x128xf32, #tpu.memory_space<vmem>>, vector<16x128xf32>,
    return
  }
  func.func @transform_0(%arg0: i32, %arg1: i32) -> (i32, i32) {
    %c0_i32 = arith.constant 0 : i32
    %c0_i32_0 = arith.constant 0 : i32
    return %c0_i32, %arg1 : i32, i32
  }
  func.func @transform_1(%arg0: i32, %arg1: i32) -> (i32, i32) {
    %c0_i32 = arith.constant 0 : i32
    return %arg1, %arg0 : i32, i32
  }
  func.func @transform_2(%arg0: i32, %arg1: i32) -> (i32, i32) {
    %c0_i32 = arith.constant 0 : i32
    %c0_i32_0 = arith.constant 0 : i32
    return %c0_i32, %arg0 : i32, i32
  }
}

module attributes {stable_mosaic.version = 11 : i64} {
  func.func @_score_kernel(%arg0: i32, %arg1: memref<16x128xf32, #tpu.memory_space<vmem>>, %arg2: memref<128x128xbf16, #tpu.memory_space<vmem>>, %arg3: memref<16x128xf32, #tpu.memory_space<vmem>>) attributes {dimension_semantics = [#tpu.dimension_semantics<parallel>], iteration_bounds = array<i64: 1>, scalar_prefetch = 0 : i64, scratch_operands = 0 : i64, tpu.core_type = #tpu.core_type<tc>, window_params = [{pipeline_mode = #tpu.pipeline_mode<synchronous>, transform_indices = @transform_0, window_bounds = array<i64: 16, 128>}, {transform_indices = @transform_1, window_bounds = array<i64: 128, 128>}, {transform_indices = @transform_2, window_bounds = array<i64: 16, 128>}]} {
    %c0 = arith.constant 0 : index
    %c0_0 = arith.constant 0 : index
    %0 = vector.load %arg1[%c0, %c0_0] : memref<16x128xf32, #tpu.memory_space<vmem>>, vector<16x128xf32>
    %1 = arith.mulf %0, %0 : vector<16x128xf32>
    %cst = arith.constant dense<0.000000e+00> : vector<16xf32>
    %2 = vector.multi_reduction <add>, %1, %cst [1] : vector<16x128xf32> to vector<16xf32>
    %3 = vector.shape_cast %2 : vector<16xf32> to vector<16x1xf32>
    %cst_1 = arith.constant 9.99999996E-13 : f32
    %4 = vector.broadcast %cst_1 : f32 to vector<16x1xf32>
    %5 = arith.addf %3, %4 : vector<16x1xf32>
    %6 = math.rsqrt %5 : vector<16x1xf32>
    %7 = vector.broadcast %6 : vector<16x1xf32> to vector<16x128xf32>
    %8 = arith.mulf %0, %7 : vector<16x128xf32>
    %9 = arith.truncf %8 : vector<16x128xf32> to vector<16x128xbf16>
    %c0_2 = arith.constant 0 : index
    %c0_3 = arith.constant 0 : index
    %10 = vector.load %arg2[%c0_2, %c0_3] : memref<128x128xbf16, #tpu.memory_space<vmem>>, vector<128x128xbf16>
    %cst_4 = arith.constant dense<0.000000e+00> : vector<16x128xf32>
    %11 = tpu.matmul %9, %10, %cst_4 {dimension_numbers = #tpu.dot_dimension_numbers<[1], [0], [0], [1], [0, 0, 1, 1], [], []>} : vector<16x128xbf16>, vector<128x128xbf16>, vector<16x128xf32> -> vector<16x128xf32>
    %c0_5 = arith.constant 0 : index
    %c0_6 = arith.constant 0 : index
    %12 = vector.load %arg3[%c0_5, %c0_6] : memref<16x128xf32, #tpu.memory_space<vmem>>, vector<16x128xf32>
    tpu.vector_store %arg3[%c0_5, %c0_6], %11 {strides = array<i32>} : memref<16x128xf32, #tpu.memory_space<vmem>>, vector<16x128xf32>,
    return
  }
  func.func @transform_0(%arg0: i32) -> (i32, i32) {
    %c0_i32 = arith.constant 0 : i32
    %c0_i32_0 = arith.constant 0 : i32
    %c0_i32_1 = arith.constant 0 : i32
    return %c0_i32, %c0_i32_0 : i32, i32
  }
  func.func @transform_1(%arg0: i32) -> (i32, i32) {
    %c0_i32 = arith.constant 0 : i32
    %c0_i32_0 = arith.constant 0 : i32
    return %c0_i32, %arg0 : i32, i32
  }
  func.func @transform_2(%arg0: i32) -> (i32, i32) {
    %c0_i32 = arith.constant 0 : i32
    %c0_i32_0 = arith.constant 0 : i32
    return %c0_i32, %arg0 : i32, i32
  }
}

</mosaic_0001>

<bundles_post_ra>
// kernel: languagebind_super_forward.3
= control target key start
LH: loop header
LB: loop body
LE: loop exit
PB: predicated region body
PF: predicated region fallthrough
CT: control target
= control target key end

     0   :  { %v189_v2 = vmov 0.0   ;;  %vm190_vm0 = vmmov 0   ;;  %s242_s0 = inlined_call_operand.vmem [shape: f32[16,128], index: 0, kind: input, shape index: {}]   ;;  %s243_s1 = inlined_call_operand.vmem [shape: bf16[128,128], index: 1, kind: input, shape index: {}]   ;;  %s244_s2 = inlined_call_operand.vmem [shape: f32[16,128], index: 2, kind: output, shape index: {}]  }
   0x1   :  { %v12_v0 = vld [vmem:[%s242_s0] sm:$0xff]  ;;  %v13_v1 = vld [vmem:[%s242_s0 + $0x8] sm:$0xff]  ;;  %155 = vmatprep.subr.bf16.mxu0 %v189_v2  ;;  %v177_v4 = vld [vmem:[%s243_s1 + $0x38] sm:$0xff]   ;;  %171 = vmatprep.mubr.msk.bf16.mxu0 %vm190_vm0, %v189_v2 }
   0x2   :  { %v14_v3 = vmul.f32 %v12_v0, %v12_v0  ;;  %v178_v5 = vld [vmem:[%s243_s1 + $0x30] sm:$0xff]   ;;  %v15_v6 = vmul.f32 %v13_v1, %v13_v1  ;;  %156 = vmatpush3.bf16.msra.mxu0 %v177_v4  ;;  %v179_v7 = vld [vmem:[%s243_s1 + $0x28] sm:$0xff]   ;;  %v180_v8 = vld [vmem:[%s243_s1 + $0x20] sm:$0xff]  }
   0x3   :  { %157 = vmatprep.subr.bf16.mxu0 %v189_v2  ;;  %v181_v9 = vld [vmem:[%s243_s1 + $0x18] sm:$0xff]   ;;  %v182_v10 = vld [vmem:[%s243_s1 + $0x10] sm:$0xff]   ;;  %v183_v11 = vld [vmem:[%s243_s1 + $0x8] sm:$0xff]  }
   0x4   :  { %16 = vadd.xlane.f32.xlu0 %v14_v3  ;;  %v184_v12 = vld [vmem:[%s243_s1] sm:$0xff]  }
   0x6   :  { %158 = vmatpush3.bf16.msra.mxu0 %v178_v5 }
   0x7   :  { %159 = vmatprep.subr.bf16.mxu0 %v189_v2 }
   0x8   :  { %18 = vadd.xlane.f32.xlu0 %v15_v6 }
   0xa   :  { %160 = vmatpush3.bf16.msra.mxu0 %v179_v7 }
   0xb   :  { %161 = vmatprep.subr.bf16.mxu0 %v189_v2 }
   0xe   :  { %162 = vmatpush3.bf16.msra.mxu0 %v180_v8 }
   0xf   :  { %163 = vmatprep.subr.bf16.mxu0 %v189_v2 }
  0x12   :  { %164 = vmatpush3.bf16.msra.mxu0 %v181_v9 }
  0x13   :  { %165 = vmatprep.subr.bf16.mxu0 %v189_v2 }
  0x16   :  { %166 = vmatpush3.bf16.msra.mxu0 %v182_v10 }
  0x17   :  { %167 = vmatprep.subr.bf16.mxu0 %v189_v2 }
  0x1a   :  { %168 = vmatpush3.bf16.msra.mxu0 %v183_v11 }
  0x1b   :  { %169 = vmatprep.subr.bf16.mxu0 %v189_v2 }
  0x1e   :  { %170 = vmatpush3.bf16.msra.mxu0 %v184_v12 }
  0x8d   :  { %v17_v13 = vpop.xlane.xlu0 %16 }
  0x8e   :  { %v20_v14 = vadd.f32 1e-12, %v17_v13 }
  0x90   :  { %185 = vrsqrt.f32 %v20_v14 }
  0x91   :  { %v19_v15 = vpop.xlane.xlu0 %18 }
  0x92   :  { %v21_v16 = vadd.f32 1e-12, %v19_v15 }
  0x94   :  { %187 = vrsqrt.f32 %v21_v16 }
  0x9d   :  { %v186_v17 = vpop.eup %185 }
  0x9e   :  { %v24_v19 = vmul.f32 %v186_v17, %v12_v0 }
  0xa1   :  { %v188_v18 = vpop.eup %187 }
  0xa2   :  { %v25_v20 = vmul.f32 %v188_v18, %v13_v1 }
  0xa4   :  { %v26_v21 = vpack.c.bf16 %v25_v20, %v24_v19 }
  0xa6   :  { %172 = vmatmul.mubr.bf16.vlgmr.msra.gmra.mxu0 %v26_v21 }
 0x166   :  { %v125_v22 = vpop.f32.mrf.mxu0 }
 0x167   :  { %132 = vst [vmem:[%s244_s2] sm:$0xff] %v125_v22 }
 0x168   :  { %v173_v23 = vpop.f32.mrf.mxu0 }
 0x16a   :  { %v128_v24 = vpop.f32.mrf.mxu0 }
 0x16b   :  { %133 = vst [vmem:[%s244_s2 + $0x8] sm:$0xff] %v128_v24 }
 0x16c   :  { %v174_v25 = vpop.f32.mrf.mxu0 }

// kernel: languagebind_super_forward.2
= control target key start
LH: loop header
LB: loop body
LE: loop exit
PB: predicated region body
PF: predicated region fallthrough
CT: control target
= control target key end

     0   :  { %7 = vsyncpa [#allocation3], 0  ;;  %s1017_s9 = smov [#allocation2]   ;;  %s1068_s0 = inlined_call_operand.vmem [shape: bf16[16,1024], index: 0, kind: input, shape index: {}]   ;;  %s1069_s1 = inlined_call_operand.hbm [shape: bf16[1024,128], index: 1, kind: input, shape index: {}]   ;;  %s1070_s2 = inlined_call_operand.vmem [shape: f32[16,128], index: 2, kind: output, shape index: {}]  }
   0x1   :  { %s15_s10 = sshll.u32 %s1017_s9, 4  ;;  %s16_s10 = int_to_ptr.vmem [resolvable:$true] %s15_s10 }
   0x2   :  { %s1003_s11 = scalar_lea.vmem %s16_s10, 8192  ;;  %p1008_p1 = scmp.lt.s32.totalorder %s16_s10, %s16_s10 }
   0x3   :  { %p1004_p0 = scmp.ne.s32.totalorder %s16_s10, %s1003_s11  ;;  %p1009_p2 = scmp.lt.s32.totalorder %s1003_s11, %s1003_s11 }
   0x5   :  { %p1010_p3 = por %p1009_p2, %p1008_p1 }
   0x7   :  { %p1011_p4 = pnand %p1010_p3, %p1004_p0 }
   0x9   :  { %1014 = shalt.err (!%p1011_p4)
}
   0xa   :  { %s1018_s12 = smov 64   ;;  %s1019_s13 = smov 4  }
   0xb   :  { %21 = dma.hbm_to_vmem [thread:$0]  %s1069_s1, 8192, %s16_s10, [#allocation3], %s1018_s12, %s1018_s12, %s1019_s13  }
   0xc   :  { %1015 = dma.done.wait [#allocation3], 8192  }
   0xd   :  { %1016 = vsyncadd [#allocation3], 4294959104  ;;  %v931_v0 = vld [vmem:[#allocation2 + $0x78] sm:$0xff]   ;;  %v935_v4 = vld [vmem:[#allocation2 + $0x70] sm:$0xff]  }
   0xe   :  { %v932_v1 = vld [vmem:[#allocation2 + $0xf8] sm:$0xff]   ;;  %839 = vmatprep.subr.bf16.mxu0 %v931_v0  ;;  %v936_v5 = vld [vmem:[#allocation2 + $0xf0] sm:$0xff]   ;;  %v939_v8 = vld [vmem:[#allocation2 + $0x68] sm:$0xff]  }
   0xf   :  { %v933_v2 = vld [vmem:[#allocation2 + $0x38] sm:$0xff]   ;;  %861 = vmatprep.subr.bf16.mxu1 %v932_v1  ;;  %v937_v6 = vld [vmem:[#allocation2 + $0x30] sm:$0xff]   ;;  %v940_v9 = vld [vmem:[#allocation2 + $0xe8] sm:$0xff]  }
  0x10   :  { %v934_v3 = vld [vmem:[#allocation2 + $0xb8] sm:$0xff]   ;;  %840 = vmatpush3.bf16.msra.mxu0 %v933_v2  ;;  %v938_v7 = vld [vmem:[#allocation2 + $0xb0] sm:$0xff]   ;;  %v941_v10 = vld [vmem:[#allocation2 + $0x28] sm:$0xff]  }
  0x11   :  { %862 = vmatpush3.bf16.msra.mxu1 %v934_v3  ;;  %841 = vmatprep.subr.bf16.mxu0 %v935_v4  ;;  %v942_v11 = vld [vmem:[#allocation2 + $0xa8] sm:$0xff]   ;;  %v943_v12 = vld [vmem:[#allocation2 + $0x60] sm:$0xff]   ;;  %v947_v16 = vld [vmem:[#allocation2 + $0x58] sm:$0xff]  }
  0x12   :  { %863 = vmatprep.subr.bf16.mxu1 %v936_v5  ;;  %v944_v13 = vld [vmem:[#allocation2 + $0xe0] sm:$0xff]   ;;  %v948_v17 = vld [vmem:[#allocation2 + $0xd8] sm:$0xff]   ;;  %v951_v20 = vld [vmem:[#allocation2 + $0x50] sm:$0xff]  }
  0x13   :  { %v945_v14 = vld [vmem:[#allocation2 + $0x20] sm:$0xff]   ;;  %v949_v18 = vld [vmem:[#allocation2 + $0x18] sm:$0xff]   ;;  %v952_v21 = vld [vmem:[#allocation2 + $0xd0] sm:$0xff]  }
  0x14   :  { %842 = vmatpush3.bf16.msra.mxu0 %v937_v6  ;;  %v946_v15 = vld [vmem:[#allocation2 + $0xa0] sm:$0xff]   ;;  %v950_v19 = vld [vmem:[#allocation2 + $0x98] sm:$0xff]   ;;  %v953_v22 = vld [vmem:[#allocation2 + $0x10] sm:$0xff]  }
  0x15   :  { %864 = vmatpush3.bf16.msra.mxu1 %v938_v7  ;;  %843 = vmatprep.subr.bf16.mxu0 %v939_v8  ;;  %v954_v23 = vld [vmem:[#allocation2 + $0x90] sm:$0xff]   ;;  %v955_v24 = vld [vmem:[#allocation2 + $0x48] sm:$0xff]   ;;  %v959_v28 = vld [vmem:[#allocation2 + $0x40] sm:$0xff]  }
  0x16   :  { %865 = vmatprep.subr.bf16.mxu1 %v940_v9  ;;  %v956_v25 = vld [vmem:[#allocation2 + $0xc8] sm:$0xff]   ;;  %v960_v29 = vld [vmem:[#allocation2 + $0xc0] sm:$0xff]   ;;  %v963_v40 = vld [vmem:[#allocation2 + $0x178] sm:$0xff]  }
  0x17   :  { %v957_v26 = vld [vmem:[#allocation2 + $0x8] sm:$0xff]   ;;  %v961_v30 = vld [vmem:[#allocation2] sm:$0xff]   ;;  %v964_v41 = vld [vmem:[#allocation2 + $0x1f8] sm:$0xff]  }
  0x18   :  { %844 = vmatpush3.bf16.msra.mxu0 %v941_v10  ;;  %v958_v27 = vld [vmem:[#allocation2 + $0x88] sm:$0xff]   ;;  %v962_v31 = vld [vmem:[#allocation2 + $0x80] sm:$0xff]   ;;  %v965_v42 = vld [vmem:[#allocation2 + $0x138] sm:$0xff]  }
  0x19   :  { %866 = vmatpush3.bf16.msra.mxu1 %v942_v11  ;;  %845 = vmatprep.subr.bf16.mxu0 %v943_v12  ;;  %v34_v32 = vld [vmem:[%s1068_s0] sm:$0xff]  ;;  %v35_v34 = vld [vmem:[%s1068_s0 + $0x8] sm:$0xff]  ;;  %v966_v43 = vld [vmem:[#allocation2 + $0x1b8] sm:$0xff]  }
  0x1a   :  { %867 = vmatprep.subr.bf16.mxu1 %v944_v13  ;;  %v38_v33 = vld [vmem:[%s1068_s0 + $0x20] sm:$0xff]  ;;  %v39_v37 = vld [vmem:[%s1068_s0 + $0x28] sm:$0xff]  ;;  %v967_v44 = vld [vmem:[#allocation2 + $0x170] sm:$0xff]  }
  0x1b   :  { %v767_v35 = vcombine.low %v34_v32, %v38_v33  ;;  %v768_v36 = vcombine.high %v34_v32, %v38_v33  ;;  %v769_v38 = vcombine.low %v35_v34, %v39_v37  ;;  %v770_v39 = vcombine.high %v35_v34, %v39_v37  ;;  %v968_v45 = vld [vmem:[#allocation2 + $0x1f0] sm:$0xff]   ;;  %v971_v48 = vld [vmem:[#allocation2 + $0x168] sm:$0xff]   ;;  %v975_v52 = vld [vmem:[#allocation2 + $0x160] sm:$0xff]  }
  0x1c   :  { %846 = vmatpush3.bf16.msra.mxu0 %v945_v14  ;;  %v969_v46 = vld [vmem:[#allocation2 + $0x130] sm:$0xff]   ;;  %v972_v49 = vld [vmem:[#allocation2 + $0x1e8] sm:$0xff]   ;;  %v976_v53 = vld [vmem:[#allocation2 + $0x1e0] sm:$0xff]  }
  0x1d   :  { %868 = vmatpush3.bf16.msra.mxu1 %v946_v15  ;;  %847 = vmatprep.subr.bf16.mxu0 %v947_v16  ;;  %v970_v47 = vld [vmem:[#allocation2 + $0x1b0] sm:$0xff]   ;;  %v973_v50 = vld [vmem:[#allocation2 + $0x128] sm:$0xff]   ;;  %v977_v54 = vld [vmem:[#allocation2 + $0x120] sm:$0xff]  }
  0x1e   :  { %869 = vmatprep.subr.bf16.mxu1 %v948_v17  ;;  %626 = vmatprep.mubr.bf16.mxu0 %v768_v36  ;;  %v974_v51 = vld [vmem:[#allocation2 + $0x1a8] sm:$0xff]   ;;  %v978_v55 = vld [vmem:[#allocation2 + $0x1a0] sm:$0xff]   ;;  %v979_v56 = vld [vmem:[#allocation2 + $0x158] sm:$0xff]  }
  0x1f   :  { %667 = vmatprep.mubr.bf16.mxu1 %v770_v39  ;;  %v980_v57 = vld [vmem:[#allocation2 + $0x1d8] sm:$0xff]   ;;  %v983_v60 = vld [vmem:[#allocation2 + $0x150] sm:$0xff]   ;;  %v987_v0 = vld [vmem:[#allocation2 + $0x148] sm:$0xff]  }
  0x20   :  { %848 = vmatpush3.bf16.msra.mxu0 %v949_v18  ;;  %v981_v58 = vld [vmem:[#allocation2 + $0x118] sm:$0xff]   ;;  %v984_v61 = vld [vmem:[#allocation2 + $0x1d0] sm:$0xff]   ;;  %v988_v1 = vld [vmem:[#allocation2 + $0x1c8] sm:$0xff]  }
  0x21   :  { %870 = vmatpush3.bf16.msra.mxu1 %v950_v19  ;;  %849 = vmatprep.subr.bf16.mxu0 %v951_v20  ;;  %v982_v59 = vld [vmem:[#allocation2 + $0x198] sm:$0xff]   ;;  %v985_v62 = vld [vmem:[#allocation2 + $0x110] sm:$0xff]   ;;  %v989_v2 = vld [vmem:[#allocation2 + $0x108] sm:$0xff]  }
  0x22   :  { %871 = vmatprep.subr.bf16.mxu1 %v952_v21  ;;  %v986_v63 = vld [vmem:[#allocation2 + $0x190] sm:$0xff]   ;;  %v990_v3 = vld [vmem:[#allocation2 + $0x188] sm:$0xff]   ;;  %v991_v4 = vld [vmem:[#allocation2 + $0x140] sm:$0xff]  }
  0x23   :  { %v992_v5 = vld [vmem:[#allocation2 + $0x1c0] sm:$0xff]   ;;  %v36_v8 = vld [vmem:[%s1068_s0 + $0x10] sm:$0xff]  ;;  %v37_v12 = vld [vmem:[%s1068_s0 + $0x18] sm:$0xff] }
  0x24   :  { %850 = vmatpush3.bf16.msra.mxu0 %v953_v22  ;;  %v993_v6 = vld [vmem:[#allocation2 + $0x100] sm:$0xff]   ;;  %v40_v9 = vld [vmem:[%s1068_s0 + $0x30] sm:$0xff]  ;;  %v41_v13 = vld [vmem:[%s1068_s0 + $0x38] sm:$0xff] }
  0x25   :  { %872 = vmatpush3.bf16.msra.mxu1 %v954_v23  ;;  %851 = vmatprep.subr.bf16.mxu0 %v955_v24  ;;  %v994_v7 = vld [vmem:[#allocation2 + $0x180] sm:$0xff]   ;;  %v771_v10 = vcombine.low %v36_v8, %v40_v9  ;;  %v772_v11 = vcombine.high %v36_v8, %v40_v9  ;;  %v773_v14 = vcombine.low %v37_v12, %v41_v13 }
  0x26   :  { %873 = vmatprep.subr.bf16.mxu1 %v956_v25  ;;  %v774_v15 = vcombine.high %v37_v12, %v41_v13 }
  0x28   :  { %852 = vmatpush3.bf16.msra.mxu0 %v957_v26 }
  0x29   :  { %874 = vmatpush3.bf16.msra.mxu1 %v958_v27  ;;  %853 = vmatprep.subr.bf16.mxu0 %v959_v28 }
  0x2a   :  { %875 = vmatprep.subr.bf16.mxu1 %v960_v29 }
  0x2c   :  { %854 = vmatpush3.bf16.msra.mxu0 %v961_v30 }
  0x2d   :  { %876 = vmatpush3.bf16.msra.mxu1 %v962_v31  ;;  %883 = vmatprep.subr.bf16.mxu0 %v963_v40 }
  0x2e   :  { %905 = vmatprep.subr.bf16.mxu1 %v964_v41 }
  0x2f   :  { %627 = vmatmul.mubr.bf16.vlgmr.msra.gmra.mxu0 %v767_v35 }
  0x30   :  { %668 = vmatmul.mubr.bf16.vlgmr.msra.gmra.mxu1 %v769_v38  ;;  %884 = vmatpush3.bf16.msra.mxu0 %v965_v42 }
  0x31   :  { %906 = vmatpush3.bf16.msra.mxu1 %v966_v43  ;;  %885 = vmatprep.subr.bf16.mxu0 %v967_v44 }
  0x32   :  { %907 = vmatprep.subr.bf16.mxu1 %v968_v45  ;;  %708 = vmatprep.mubr.bf16.mxu0 %v772_v11 }
  0x33   :  { %749 = vmatprep.mubr.bf16.mxu1 %v774_v15 }
  0x34   :  { %886 = vmatpush3.bf16.msra.mxu0 %v969_v46 }
  0x35   :  { %908 = vmatpush3.bf16.msra.mxu1 %v970_v47  ;;  %887 = vmatprep.subr.bf16.mxu0 %v971_v48 }
  0x36   :  { %909 = vmatprep.subr.bf16.mxu1 %v972_v49 }
  0x38   :  { %888 = vmatpush3.bf16.msra.mxu0 %v973_v50 }
  0x39   :  { %910 = vmatpush3.bf16.msra.mxu1 %v974_v51  ;;  %889 = vmatprep.subr.bf16.mxu0 %v975_v52 }
  0x3a   :  { %911 = vmatprep.subr.bf16.mxu1 %v976_v53 }
  0x3c   :  { %890 = vmatpush3.bf16.msra.mxu0 %v977_v54 }
  0x3d   :  { %912 = vmatpush3.bf16.msra.mxu1 %v978_v55  ;;  %891 = vmatprep.subr.bf16.mxu0 %v979_v56 }
  0x3e   :  { %913 = vmatprep.subr.bf16.mxu1 %v980_v57 }
  0x40   :  { %892 = vmatpush3.bf16.msra.mxu0 %v981_v58 }
  0x41   :  { %914 = vmatpush3.bf16.msra.mxu1 %v982_v59  ;;  %893 = vmatprep.subr.bf16.mxu0 %v983_v60 }
  0x42   :  { %915 = vmatprep.subr.bf16.mxu1 %v984_v61 }
  0x44   :  { %894 = vmatpush3.bf16.msra.mxu0 %v985_v62 }
  0x45   :  { %916 = vmatpush3.bf16.msra.mxu1 %v986_v63  ;;  %895 = vmatprep.subr.bf16.mxu0 %v987_v0 }
  0x46   :  { %917 = vmatprep.subr.bf16.mxu1 %v988_v1 }
  0x48   :  { %896 = vmatpush3.bf16.msra.mxu0 %v989_v2 }
  0x49   :  { %918 = vmatpush3.bf16.msra.mxu1 %v990_v3  ;;  %897 = vmatprep.subr.bf16.mxu0 %v991_v4 }
  0x4a   :  { %919 = vmatprep.subr.bf16.mxu1 %v992_v5 }
  0x4c   :  { %898 = vmatpush3.bf16.msra.mxu0 %v993_v6 }
  0x4d   :  { %920 = vmatpush3.bf16.msra.mxu1 %v994_v7 }
  0x4f   :  { %709 = vmatmul.mubr.bf16.vlgmr.msra.gmra.mxu0 %v771_v10 }
  0x50   :  { %750 = vmatmul.mubr.bf16.vlgmr.msra.gmra.mxu1 %v773_v14 }
  0xef   :  { %v855_v16 = vpop.f32.mrf.mxu0 }
  0xf0   :  { %v877_v17 = vpop.f32.mrf.mxu1 }
  0xf1   :  { %v856_v18 = vpop.f32.mrf.mxu0 }
  0xf2   :  { %v878_v19 = vpop.f32.mrf.mxu1  ;;  %v857_v23 = vadd.f32 %v856_v18, %v855_v16 }
  0xf3   :  { %v858_v20 = vpop.f32.mrf.mxu0  ;;  %v879_v24 = vadd.f32 %v878_v19, %v877_v17 }
  0xf4   :  { %v880_v21 = vpop.f32.mrf.mxu1 }
  0xf5   :  { %v859_v22 = vpop.f32.mrf.mxu0  ;;  %v670_v29 = vadd.f32 %v879_v24, %v857_v23 }
  0xf6   :  { %v881_v25 = vpop.f32.mrf.mxu1  ;;  %v860_v30 = vadd.f32 %v859_v22, %v858_v20 }
  0xf7   :  { %v882_v31 = vadd.f32 %v881_v25, %v880_v21 }
  0xf9   :  { %v673_v39 = vadd.f32 %v882_v31, %v860_v30 }
 0x10f   :  { %v899_v26 = vpop.f32.mrf.mxu0 }
 0x110   :  { %v921_v27 = vpop.f32.mrf.mxu1 }
 0x111   :  { %v900_v28 = vpop.f32.mrf.mxu0 }
 0x112   :  { %v901_v32 = vadd.f32 %v900_v28, %v899_v26  ;;  %v922_v33 = vpop.f32.mrf.mxu1 }
 0x113   :  { %v902_v34 = vpop.f32.mrf.mxu0  ;;  %v923_v36 = vadd.f32 %v922_v33, %v921_v27 }
 0x114   :  { %v711_v35 = vadd.f32 %v901_v32, %v670_v29  ;;  %v924_v37 = vpop.f32.mrf.mxu1 }
 0x115   :  { %v903_v38 = vpop.f32.mrf.mxu0 }
 0x116   :  { %v752_v40 = vadd.f32 %v923_v36, %v711_v35  ;;  %v904_v41 = vadd.f32 %v903_v38, %v902_v34  ;;  %v925_v42 = vpop.f32.mrf.mxu1 }
 0x117   :  { %v926_v44 = vadd.f32 %v925_v42, %v924_v37 }
 0x118   :  { %v714_v43 = vadd.f32 %v904_v41, %v673_v39  ;;  %760 = vst [vmem:[%s1070_s2] sm:$0xff] %v752_v40 }
 0x11a   :  { %v755_v45 = vadd.f32 %v926_v44, %v714_v43 }
 0x11c   :  { %761 = vst [vmem:[%s1070_s2 + $0x8] sm:$0xff] %v755_v45 }
 0x11d   :  { %766 = vsyncpa [#allocation3], 1 }

</bundles_post_ra>
